<compile_context>
chip_gen: v5e
topology: v5e:2x2
jax: 0.10.0
libtpu: 0.0.40
codegen_flags: <defaults>
</compile_context>

<pallas_src>
import functools

import jax
import jax.numpy as jnp
from jax.experimental import pallas as pl
from jax.experimental.pallas import tpu as pltpu


def _round_up(x, m):
    return ((x + m - 1) // m) * m


def _pick_tile(dim, cap):
    """Largest multiple of 128 that divides `dim` and is <= cap (needs dim % 128 == 0)."""
    t = (min(cap, dim) // 128) * 128
    while dim % t:
        t -= 128
    return t


@functools.lru_cache(maxsize=1)
def _vmem_limit_bytes():
    # ~25% headroom below physical VMEM per TensorCore (64 MiB v7x, 128 MiB v5e/v6e).
    try:
        cap = pltpu.get_tpu_info().vmem_capacity_bytes
    except Exception:  # conservative fallback
        cap = 64 * 1024 * 1024
    return int(cap) * 3 // 4


def _linear_relu_kernel(x_ref, w_ref, b_ref, o_ref):
    """One (tm, tn) output tile; K is the last ('arbitrary') grid axis.

    The output block stays VMEM-resident across K, so it doubles as the f32
    accumulator: bias-init at k==0, MXU accumulate each step, ReLU at k==last.
    """
    k = pl.program_id(2)

    @pl.when(k == 0)
    def _():
        o_ref[...] = jnp.broadcast_to(b_ref[...], o_ref.shape)

    # bf16 operands (cast in VMEM, no extra HBM pass), f32 MXU accumulation.
    o_ref[...] += jnp.dot(
        x_ref[...].astype(jnp.bfloat16),
        w_ref[...].astype(jnp.bfloat16),
        preferred_element_type=jnp.float32,
    )

    @pl.when(k == pl.num_programs(2) - 1)
    def _():
        o_ref[...] = jnp.maximum(o_ref[...], 0.0)


@functools.partial(jax.jit, static_argnames=("batch_size",))
def split_model_forward(x, w, b, batch_size):
    """Equivalent of: torch.cat([model(xs) for xs in x.split(batch_size)], dim=0)

    with model(z) = relu(z @ w + b).  The inner model is row-wise, so the
    chunking by `batch_size` does not change the result; tiling is chosen for
    the MXU / HBM instead.
    """
    del batch_size  # split->apply->cat is chunk-size independent for a row-wise model
    n, d_in = x.shape
    d_out = w.shape[1]
    assert d_in % 128 == 0, "d_in must be a multiple of 128"
    assert d_out % 128 == 0, "d_out must be a multiple of 128"

    # MXU/HBM-driven tiles (decoupled from the PyTorch batch_size).
    tn = _pick_tile(d_out, 512)            # lane-dense output tile
    tk = _pick_tile(d_in, 1024)            # K reduction tile
    tm = min(1024, _round_up(n, 16))       # rows per step, multiple of 16

    # v7x megacore: make sure the 'parallel' axes have >= 2 grid steps when the
    # problem shape allows it, so both TensorCores get work.
    if pl.cdiv(n, tm) * (d_out // tn) < 2:
        if d_out >= 256 and tn >= 256:
            tn = _pick_tile(d_out, tn // 2)
        elif n > 16:
            tm = _round_up(pl.cdiv(n, 2), 16)

    grid = (pl.cdiv(n, tm), d_out // tn, d_in // tk)
    b2d = b.reshape(1, d_out).astype(jnp.float32)

    return pl.pallas_call(
        _linear_relu_kernel,
        # f32 output to match the f32 PyTorch module; ragged-M edge writes are
        # masked by Pallas (no host pad/slice passes over HBM).
        out_shape=jax.ShapeDtypeStruct((n, d_out), jnp.float32),
        grid_spec=pltpu.PrefetchScalarGridSpec(
            num_scalar_prefetch=0,
            grid=grid,
            in_specs=[
                # (tm, tk) slab of rows (covers many PyTorch "splits" at once)
                pl.BlockSpec((tm, tk), lambda i, j, k: (i, k)),
                # (tk, tn) weight tile
                pl.BlockSpec((tk, tn), lambda i, j, k: (k, j)),
                # bias tile for this output column block
                pl.BlockSpec((1, tn), lambda i, j, k: (0, j)),
            ],
            # writing row-block i == torch.cat(y, dim=0)
            out_specs=pl.BlockSpec((tm, tn), lambda i, j, k: (i, j)),
        ),
        compiler_params=pltpu.CompilerParams(
            dimension_semantics=("parallel", "parallel", "arbitrary"),
            vmem_limit_bytes=_vmem_limit_bytes(),
        ),
    )(x, w, b2d)


if __name__ == "__main__":
    key = jax.random.PRNGKey(0)
    k_x, k_w, k_b = jax.random.split(key, 3)

    # Small shapes: total batch 32, chunk size 8 -> 4 "splits"; hidden 128.
    N, D_IN, D_OUT = 32, 128, 128
    BATCH_SIZE = 8

    x = jax.random.normal(k_x, (N, D_IN), dtype=jnp.float32)
    w = jax.random.normal(k_w, (D_IN, D_OUT), dtype=jnp.float32) * 0.02
    b = jax.random.normal(k_b, (D_OUT,), dtype=jnp.float32) * 0.01

    out = jax.block_until_ready(split_model_forward(x, w, b, BATCH_SIZE))
    assert out.shape == (N, D_OUT) and out.dtype == jnp.float32

    # Strict check against a matched-precision (bf16 operand, f32 accum) reference.
    x_bf = x.astype(jnp.bfloat16).astype(jnp.float32)
    w_bf = w.astype(jnp.bfloat16).astype(jnp.float32)
    ref_bf16 = jnp.maximum(x_bf @ w_bf + b, 0.0)
    assert jnp.allclose(out, ref_bf16, atol=1e-3, rtol=1e-3)

    # Semantic check: the PyTorch module (per-chunk apply + concat) in f32.
    # Note: bf16 MXU operands deviate from pure f32 roughly like sqrt(d_in)*2^-9.
    ref_split = jnp.concatenate(
        [jnp.maximum(x[i:i + BATCH_SIZE] @ w + b, 0.0)
         for i in range(0, N, BATCH_SIZE)],
        axis=0,
    )
    assert jnp.allclose(out, ref_split, atol=1e-2, rtol=1e-2)

    print("KERNEL_OK")
</pallas_src>

<mosaic_0001>
module attributes {stable_mosaic.version = 11 : i64} {
  func.func @_linear_relu_kernel(%arg0: i32, %arg1: i32, %arg2: i32, %arg3: memref<16x128xf32, #tpu.memory_space<vmem>>, %arg4: memref<128x128xf32, #tpu.memory_space<vmem>>, %arg5: memref<1x128xf32, #tpu.memory_space<vmem>>, %arg6: memref<16x128xf32, #tpu.memory_space<vmem>>) attributes {dimension_semantics = [#tpu.dimension_semantics<parallel>, #tpu.dimension_semantics<parallel>, #tpu.dimension_semantics<arbitrary>], iteration_bounds = array<i64: 2, 1, 1>, scalar_prefetch = 0 : i64, scratch_operands = 0 : i64, tpu.core_type = #tpu.core_type<tc>, window_params = [{transform_indices = @transform_0, window_bounds = array<i64: 16, 128>}, {transform_indices = @transform_1, window_bounds = array<i64: 128, 128>}, {transform_indices = @transform_2, window_bounds = array<i64: 1, 128>}, {transform_indices = @transform_3, window_bounds = array<i64: 16, 128>}]} {
    %c0_i32 = arith.constant 0 : i32
    %0 = arith.cmpi eq, %arg2, %c0_i32 : i32
    %1 = arith.extui %0 : i1 to i32
    %c0_i32_0 = arith.constant 0 : i32
    %2 = arith.cmpi ne, %1, %c0_i32_0 : i32
    scf.if %2 {
      %c0_10 = arith.constant 0 : index
      %c0_11 = arith.constant 0 : index
      %14 = vector.load %arg5[%c0_10, %c0_11] : memref<1x128xf32, #tpu.memory_space<vmem>>, vector<1x128xf32>
      %15 = vector.shape_cast %14 : vector<1x128xf32> to vector<1x128xf32>
      %16 = vector.broadcast %15 : vector<1x128xf32> to vector<16x128xf32>
      %c0_12 = arith.constant 0 : index
      %c0_13 = arith.constant 0 : index
      %17 = vector.load %arg6[%c0_12, %c0_13] : memref<16x128xf32, #tpu.memory_space<vmem>>, vector<16x128xf32>
      tpu.vector_store %arg6[%c0_12, %c0_13], %16 {strides = array<i32>} : memref<16x128xf32, #tpu.memory_space<vmem>>, vector<16x128xf32>,
    } else {
    }
    %c0 = arith.constant 0 : index
    %c0_1 = arith.constant 0 : index
    %3 = vector.load %arg6[%c0, %c0_1] : memref<16x128xf32, #tpu.memory_space<vmem>>, vector<16x128xf32>
    %c0_2 = arith.constant 0 : index
    %c0_3 = arith.constant 0 : index
    %4 = vector.load %arg3[%c0_2, %c0_3] : memref<16x128xf32, #tpu.memory_space<vmem>>, vector<16x128xf32>
    %5 = arith.truncf %4 : vector<16x128xf32> to vector<16x128xbf16>
    %c0_4 = arith.constant 0 : index
    %c0_5 = arith.constant 0 : index
    %6 = vector.load %arg4[%c0_4, %c0_5] : memref<128x128xf32, #tpu.memory_space<vmem>>, vector<128x128xf32>
    %7 = arith.truncf %6 : vector<128x128xf32> to vector<128x128xbf16>
    %cst = arith.constant dense<0.000000e+00> : vector<16x128xf32>
    %8 = tpu.matmul %5, %7, %cst {dimension_numbers = #tpu.dot_dimension_numbers<[1], [0], [0], [1], [0, 0, 1, 1], [], []>} : vector<16x128xbf16>, vector<128x128xbf16>, vector<16x128xf32> -> vector<16x128xf32>
    %9 = arith.addf %3, %8 : vector<16x128xf32>
    %c0_6 = arith.constant 0 : index
    %c0_7 = arith.constant 0 : index
    %10 = vector.load %arg6[%c0_6, %c0_7] : memref<16x128xf32, #tpu.memory_space<vmem>>, vector<16x128xf32>
    tpu.vector_store %arg6[%c0_6, %c0_7], %9 {strides = array<i32>} : memref<16x128xf32, #tpu.memory_space<vmem>>, vector<16x128xf32>,
    %c0_i32_8 = arith.constant 0 : i32
    %11 = arith.cmpi eq, %arg2, %c0_i32_8 : i32
    %12 = arith.extui %11 : i1 to i32
    %c0_i32_9 = arith.constant 0 : i32
    %13 = arith.cmpi ne, %12, %c0_i32_9 : i32
    scf.if %13 {
      %c0_10 = arith.constant 0 : index
      %c0_11 = arith.constant 0 : index
      %14 = vector.load %arg6[%c0_10, %c0_11] : memref<16x128xf32, #tpu.memory_space<vmem>>, vector<16x128xf32>
      %cst_12 = arith.constant 0.000000e+00 : f32
      %15 = vector.broadcast %cst_12 : f32 to vector<16x128xf32>
      %16 = arith.maximumf %14, %15 : vector<16x128xf32>
      %c0_13 = arith.constant 0 : index
      %c0_14 = arith.constant 0 : index
      %17 = vector.load %arg6[%c0_13, %c0_14] : memref<16x128xf32, #tpu.memory_space<vmem>>, vector<16x128xf32>
      tpu.vector_store %arg6[%c0_13, %c0_14], %16 {strides = array<i32>} : memref<16x128xf32, #tpu.memory_space<vmem>>, vector<16x128xf32>,
    } else {
    }
    return
  }
  func.func @transform_0(%arg0: i32, %arg1: i32, %arg2: i32) -> (i32, i32) {
    %c0_i32 = arith.constant 0 : i32
    return %arg0, %arg2 : i32, i32
  }
  func.func @transform_1(%arg0: i32, %arg1: i32, %arg2: i32) -> (i32, i32) {
    %c0_i32 = arith.constant 0 : i32
    return %arg2, %arg1 : i32, i32
  }
  func.func @transform_2(%arg0: i32, %arg1: i32, %arg2: i32) -> (i32, i32) {
    %c0_i32 = arith.constant 0 : i32
    %c0_i32_0 = arith.constant 0 : i32
    return %c0_i32, %arg1 : i32, i32
  }
  func.func @transform_3(%arg0: i32, %arg1: i32, %arg2: i32) -> (i32, i32) {
    %c0_i32 = arith.constant 0 : i32
    return %arg0, %arg1 : i32, i32
  }
}

</mosaic_0001>

<bundles_post_ra>
// kernel: split_model_forward.1
= control target key start
LH: loop header
LB: loop body
LE: loop exit
PB: predicated region body
PF: predicated region fallthrough
CT: control target
= control target key end

     0   :  { %s894_s0 = inlined_call_operand.hbm [shape: f32[32,128], index: 0, kind: input, shape index: {}]   ;;  %s895_s1 = inlined_call_operand.hbm [shape: f32[128,128], index: 1, kind: input, shape index: {}]   ;;  %s896_s2 = inlined_call_operand.vmem [shape: f32[1,128], index: 2, kind: input, shape index: {}]   ;;  %s897_s3 = inlined_call_operand.hbm [shape: f32[32,128], index: 3, kind: output, shape index: {}]  }
   0x1   :  { %899 = sst [smem:[#allocation11_spill]] %s895_s1 }
   0x2   :  { %8 = vsyncpa [#allocation3], 0 }
   0x3   :  { %10 = vsyncpa [#allocation3 + $0x1], 0 }
   0x4   :  { %11 = vsyncpa [#allocation6], 0 }
   0x5   :  { %12 = vsyncpa [#allocation4], 0 }
   0x6   :  { %14 = vsyncpa [#allocation4 + $0x1], 0  ;;  %s728_s12 = smov 0   ;;  %s730_s13 = smov 0  }
   0x7   :  { %s732_s14 = smov 0   ;;  %s734_s15 = smov 0  }
   0x8   :  { %s736_s16 = smov 0   ;;  %s738_s17 = smov 0  }
   0x9 LB: > { %s457_s18 = sadd.s32 4294967295, %s701_s17   ;;  %s458_s19 = sadd.s32 4294967294, %s701_s17   ;;  %s701_s17 = sphi %s738_s17, %s20_s17   ;;  %s697_s16 = sphi %s736_s16, %s913_s16   ;;  %s693_s15 = sphi %s734_s15, %s912_s15   ;;  %s689_s14 = sphi %s732_s14, %s911_s14   ;;  %s685_s13 = sphi %s730_s13, %s910_s13   ;;  %s681_s12 = sphi %s728_s12, %s909_s12  }
   0xa   : > { %p61_p0 = scmp.ne.s32.totalorder %s685_s13, %s681_s12  ;;  %p762_p1 = scmp.eq.s32.totalorder %s457_s18, 0 }
   0xb   : > { %p766_p2 = scmp.eq.s32.totalorder %s457_s18, 1  ;;  %p147_p3 = scmp.eq.s32.totalorder %s458_s19, 1 }
   0xc   : > { %p772_p4 = por %p762_p1, %p61_p0  ;;  %p459_p5 = scmp.ge.s32.totalorder %s701_s17, 1 }
   0xd   : > { %p777_p6 = por %p147_p3, %p61_p0  ;;  %p154_p7 = scmp.lt.s32.totalorder %s701_s17, 3 }
   0xe   : > { %s904_s1 = sld [smem:[#allocation11_spill]]  ;;  %s703_s28 = smov [#allocation5]  }
   0xf   : > { %p785_p8 = pnand %p459_p5, %p154_p7  ;;  %s171_s29 = sshll.u32 %s703_s28, 4  ;;  %s172_s29 = int_to_ptr.vmem [resolvable:$true] %s171_s29 }
  0x10   : > { %p462_p11 = scmp.ge.s32.totalorder %s701_s17, 2  ;;  %s898_s30 = smov 128  }
  0x11   : > { %p485_p9 = pneg %p785_p8  ;;  %s705_s4 = smov 8  }
  0x12   : > { %s39_s5 = sadd.s32 1, %s697_s16  ;;  %s48_s6 = sadd.s32 1, %s689_s14 }
  0x13   : > { %p486_p10 = pnand %p485_p9, %p762_p1  ;;  %p41_p12 = scmp.ge.s32.totalorder %s39_s5, 2 }
  0x14   : > { %s169_s26 = sshll.u32 %s904_s1, 4  ;;  %p55_p13 = scmp.ne.s32.totalorder %s689_s14, %s685_s13  ;;  %s170_s26 = int_to_ptr.hbm [resolvable:$true] %s169_s26 }
  0x15   : > { %488 = dma.hbm_to_vmem [thread:$0]  (!%p486_p10), %s170_s26, 2048, %s172_s29, [#allocation6], %s898_s30, %s898_s30, %s705_s4  }
  0x16   : > { %p56_p0 = scmp.eq.s32.totalorder %s701_s17, 0  ;;  %s915_s5 = smov (%p41_p12, %s39_s5), 0 }
  0x17   : > { %p810_p5 = por %p766_p2, %p55_p13  ;;  %s43_s9 = ssub.s32 %s697_s16, %s915_s5 }
  0x18   : > { %p804_p3 = por %p56_p0, %p55_p13  ;;  %p498_p7 = scmp.lt.s32.totalorder %s701_s17, 2 }
  0x19   : > { %p46_p9 = scmp.eq.s32.totalorder %s43_s9, 0  ;;  %s191_s10 = sand.u32 1, %s689_s14  }
  0x1a   : > { %s463_s11 = sshll.u32 %s191_s10, 4  ;;  %s475_s19 = sshll.u32 %s697_s16, 4 }
  0x1b   : > { %s819_s18 = scalar_select %p46_p9, %s689_s14, %s48_s6  }
  0x1c   : > { %s201_s26 = scalar_lea.hbm %s894_s0, %s475_s19  ;;  %s195_s28 = scalar_lea.vmem [#allocation2], %s463_s11 }
  0x1d   : > { %s204_s29 = sshll.u32 %s195_s28, 4  ;;  %s202_s21 = sshll.u32 %s201_s26, 4  ;;  %s205_s29 = int_to_ptr.vmem [resolvable:$true] %s204_s29  ;;  %s203_s21 = int_to_ptr.hbm [resolvable:$true] %s202_s21 }
  0x1e   : > { %p490_p2 = pnand %p498_p7, %p804_p3  ;;  %s192_s30 = scalar_lea.sflag [#allocation3], %s191_s10 }
  0x1f   : > { %s908_s1 = smov 128   ;;  %216 = sbr.rel (%p785_p8) target bundleno = 215 (0xd7), region = 32 }
  0x20   : > { %492 = dma.hbm_to_vmem [thread:$0]  (!%p490_p2), %s203_s21, 256, %s205_s29, %s192_s30, %s908_s1, %s908_s1, %s705_s4  }
  0x21   : > { %s833_s6 = sand.u32 (!%p785_p8), 1, %s685_s13  }
  0x22   : > { %s467_s9 = sshll.u32 (!%p785_p8), %s833_s6, 4  ;;  %s219_s11 = scalar_lea.sflag (!%p785_p8), [#allocation3], %s833_s6 }
  0x23   : > { %s839_s7 = scalar_lea.vmem (!%p785_p8), [#allocation2], %s467_s9 }
  0x24   : > { %668 = dma.done.wait (%p772_p4), %s219_s11, 256  }
  0x25   : > { %670 = vsyncadd (%p772_p4), %s219_s11, 4294967040 }
  0x26   : > { %672 = dma.done.wait (%p762_p1), [#allocation6], 2048  }
  0x27   : > { %674 = vsyncadd (%p762_p1), [#allocation6], 4294965248  ;;  %v289_v0 = vld [vmem:[#allocation5 + $0x70] sm:$0xff]  ;;  %v290_v1 = vld [vmem:[#allocation5 + $0x78] sm:$0xff]  ;;  %s476_s22 = sshll.u32 %s693_s15, 4  ;;  %s253_s10 = scalar_lea.vmem [#allocation7], %s467_s9 }
  0x28   : > { %v287_v2 = vld [vmem:[#allocation5 + $0x60] sm:$0xff]  ;;  %v298_v3 = vpack.c.bf16 %v290_v1, %v289_v0  ;;  %v288_v4 = vld [vmem:[#allocation5 + $0x68] sm:$0xff]  ;;  %v285_v6 = vld [vmem:[#allocation5 + $0x50] sm:$0xff]  ;;  %s339_s4 = scalar_lea.hbm %s897_s3, %s476_s22  ;;  %s340_s19 = sshll.u32 %s253_s10, 4  ;;  %s341_s19 = int_to_ptr.vmem [resolvable:$true] %s340_s19 }
  0x29   : > { %v297_v5 = vpack.c.bf16 %v288_v4, %v287_v2  ;;  %v286_v7 = vld [vmem:[#allocation5 + $0x58] sm:$0xff]  ;;  %v283_v9 = vld [vmem:[#allocation5 + $0x40] sm:$0xff]  ;;  %v284_v10 = vld [vmem:[#allocation5 + $0x48] sm:$0xff]  ;;  %s342_s24 = sshll.u32 %s339_s4, 4  ;;  %s327_s25 = scalar_lea.sflag [#allocation4], %s833_s6  ;;  %s343_s24 = int_to_ptr.hbm [resolvable:$true] %s342_s24 }
  0x2a   : > { %299 = vmatpush.bf16.msra.mxu0 %v298_v3  ;;  %v296_v8 = vpack.c.bf16 %v286_v7, %v285_v6  ;;  %v295_v11 = vpack.c.bf16 %v284_v10, %v283_v9  ;;  %v281_v12 = vld [vmem:[#allocation5 + $0x30] sm:$0xff]  ;;  %v282_v13 = vld [vmem:[#allocation5 + $0x38] sm:$0xff]  ;;  %v279_v15 = vld [vmem:[#allocation5 + $0x20] sm:$0xff]  ;;  %s629_s26 = sshra.s32 %s343_s24, 4  ;;  %s635_s21 = scalar_lea.hbm %s897_s3, 32  ;;  %s630_s26 = int_to_ptr.hbm [resolvable:$true] %s629_s26 }
  0x2b   : > { %v294_v14 = vpack.c.bf16 %v282_v13, %v281_v12  ;;  %v280_v16 = vld [vmem:[#allocation5 + $0x28] sm:$0xff]  ;;  %v277_v18 = vld [vmem:[#allocation5 + $0x10] sm:$0xff]  ;;  %v278_v19 = vld [vmem:[#allocation5 + $0x18] sm:$0xff]  ;;  %s631_s15 = scalar_lea.hbm %s630_s26, 16  ;;  %p636_p10 = scmp.lt.s32.totalorder %s630_s26, %s897_s3 }
  0x2c   : > { %v293_v17 = vpack.c.bf16 %v280_v16, %v279_v15  ;;  %v292_v20 = vpack.c.bf16 %v278_v19, %v277_v18  ;;  %v275_v21 = vld [vmem:[#allocation5] sm:$0xff]  ;;  %v276_v22 = vld [vmem:[#allocation5 + $0x8] sm:$0xff]  ;;  %p632_p1 = scmp.ne.s32.totalorder %s630_s26, %s631_s15  ;;  %p637_p12 = scmp.lt.s32.totalorder %s635_s21, %s631_s15 }
  0x2d   : > { %v291_v23 = vpack.c.bf16 %v276_v22, %v275_v21  ;;  %v272_v24 = vld [vmem:[%s839_s7] sm:$0xff]  ;;  %v273_v25 = vld [vmem:[%s839_s7 + $0x8] sm:$0xff] }
  0x2e   : > { %300 = vmatpush.bf16.msra.mxu0 %v297_v5  ;;  %v274_v26 = vpack.c.bf16 %v273_v25, %v272_v24  ;;  %v554_v27 = vld [vmem:[%s896_s2] ss:$0 sm:$0xff]  ;;  %p633_p4 = pnand %p632_p1, %p810_p5  ;;  %p638_p13 = por %p637_p12, %p636_p10 }
  0x30   : > { %p634_p8 = pneg %p633_p4 }
  0x32   : > { %301 = vmatpush.bf16.msra.mxu0 %v296_v8  ;;  %p639_p0 = pnand %p638_p13, %p634_p8 }
  0x36   : > { %302 = vmatpush.bf16.msra.mxu0 %v295_v11 }
  0x3a   : > { %303 = vmatpush.bf16.msra.mxu0 %v294_v14 }
  0x3e   : > { %304 = vmatpush.bf16.msra.mxu0 %v293_v17 }
  0x42   : > { %305 = vmatpush.bf16.msra.mxu0 %v292_v20 }
  0x46   : > { %306 = vmatpush.bf16.msra.mxu0 %v291_v23 }
  0x49   : > { %307 = vmatmul.bf16.vlgmr.msra.gmra.mxu0 %v274_v26 }
  0xc6   : > { %v308_v28 = vpop.f32.mrf.mxu0 }
  0xc7   : > { %v313_v29 = vadd.f32 %v554_v27, %v308_v28 }
  0xc9   : > { %v322_v30 = vmax.f32 %v313_v29, 0.0 }
  0xcb   : > { %324 = vst [vmem:[%s253_s10] sm:$0xff] %v322_v30 }
  0xce   : > { %v310_v31 = vpop.f32.mrf.mxu0 }
  0xcf   : > { %v314_v32 = vadd.f32 %v554_v27, %v310_v31 }
  0xd1   : > { %v323_v33 = vmax.f32 %v314_v32, 0.0 }
  0xd3   : > { %325 = vst [vmem:[%s253_s10 + $0x8] sm:$0xff] %v323_v33 }
  0xd4   : > { %642 = shalt.err (!%p639_p0)
}
  0xd5   : > { %s706_s6 = smov 128   ;;  %s707_s7 = smov 8  }
  0xd6   : > { %483 = dma.vmem_to_hbm [thread:$0]  (%p810_p5), %s341_s19, 256, %s343_s24, %s327_s25, %s706_s6, %s706_s6, %s707_s7  }
  0xd7 PF: > { %s357_s1 = sand.u32 1, %s681_s12   ;;  %p494_p3 = pnand %p462_p11, %p777_p6 }
  0xd8   : > { %s358_s20 = scalar_lea.sflag [#allocation4], %s357_s1 }
  0xd9   : > { %p495_p7 = pneg %p494_p3 }
  0xdb   : > { %676 = dma.done.wait (%p495_p7), %s358_s20, 256  }
  0xdc   : > { %678 = vsyncadd (%p495_p7), %s358_s20, 4294967040  ;;  %s20_s17 = sadd.s32 1, %s701_s17   ;;  %s909_s12 = smov %s685_s13 }
  0xdd   : > { %p17_p9 = scmp.ge.s32.totalorder %s20_s17, 4   ;;  %s910_s13 = smov %s689_s14 }
  0xde   : > { %s911_s14 = smov %s819_s18  ;;  %s912_s15 = smov %s697_s16 }
  0xdf   : > { %s913_s16 = smov %s915_s5  ;;  %19 = sbr.rel (!%p17_p9) target bundleno = 9 (0x9), region = 93 }
  0xe4   :  { %364 = vsyncpa [#allocation3], 1 }
  0xe5   :  { %366 = vsyncpa [#allocation3 + $0x1], 1 }
  0xe6   :  { %367 = vsyncpa [#allocation6], 1 }
  0xe7   :  { %368 = vsyncpa [#allocation4], 1 }
  0xe8   :  { %370 = vsyncpa [#allocation4 + $0x1], 1 }

</bundles_post_ra>
